<compile_context>
chip_gen: v6e
topology: v6e:2x2x1
jax: 0.10.0
libtpu: 0.0.40
codegen_flags: <defaults>
</compile_context>

<pallas_src>
import jax
import jax.numpy as jnp
from jax import lax
from jax.experimental import pallas as pl
from jax.experimental.pallas import tpu as pltpu

NEG_SLOPE = 0.01  # PyTorch nn.LeakyReLU() default


def _downsample_kernel(eo_ref, h_ref, w01_ref, w2_ref, b_ref, y_ref):
    # eo_ref : (nb, 2C, tLo)  rows [0:C] = even phase xp[2m], rows [C:2C] = odd xp[2m+1]
    # h_ref  : (nb, C, 1)     halo column xp[2*(j+1)*tLo] for this length tile
    # w01_ref: (C, 2C)        [W0 | W1]
    # w2_ref : (C, C)         W2
    # b_ref  : (C, 1)         bias
    # y_ref  : (nb, C, tLo)   output tile (lane-dense along Lo)
    nb, C, tl = y_ref.shape

    w01 = w01_ref[...]
    w2 = w2_ref[...]
    b = b_ref[...]

    # Static unroll over the folded batch elements: one DMA / grid step for all
    # of them, plain 2-D matmuls per element (identical MXU work to a batched
    # dot, but simpler lowering).  nb is kept small by the wrapper.
    for i in range(nb):
        eo = eo_ref[i]                                        # (2C, tl)

        # taps k=0,1 fused: single MXU matmul, contraction width 2C.
        acc = jnp.dot(w01, eo, preferred_element_type=jnp.float32) + b

        # tap k=2: even phase shifted by one output position (XLU roll), with
        # the tile-boundary column patched from the halo before the matmul.
        e_shift = pltpu.roll(eo[0:C, :], shift=tl - 1, axis=1)  # e_shift[:,m]=even[m+1]
        lane = lax.broadcasted_iota(jnp.int32, (C, tl), 1)
        e_shift = jnp.where(lane == tl - 1, h_ref[i], e_shift)
        acc = acc + jnp.dot(w2, e_shift, preferred_element_type=jnp.float32)

        # LeakyReLU + one full-width, unmasked store.
        acc = jnp.where(acc >= 0, acc, NEG_SLOPE * acc)
        y_ref[i] = acc.astype(y_ref.dtype)


def _pick_batch_tile(N, C, tLo):
    # Fold batch elements per grid step to amortize per-step overhead for small
    # C, while keeping the double-buffered VMEM footprint modest (v5e default
    # scoped VMEM is 16 MiB) and the static unroll small.
    budget = 8 << 20
    per_b = 4 * tLo * C * 12          # rough: 2x(2C in) + 2x(C out) + f32 temps
    nb = 1
    for cand in range(1, min(N, 8) + 1):
        if N % cand == 0 and cand * per_b <= budget:
            nb = cand
    return nb


def downsampling_forward(x, weight, bias, *, tile_lo=None, batch_tile=None):
    """Conv1d(C, C, k=3, stride=2, pad=1) + LeakyReLU, NCL layout.

    x: (N, C, L) f32, weight: (C, C, 3) f32, bias: (C,) f32 -> (N, C, Lo) f32.
    """
    N, C, L = x.shape
    K, stride, pad = 3, 2, 1
    assert weight.shape == (C, C, K) and bias.shape == (C,)
    Lo = (L + 2 * pad - K) // stride + 1

    # Lane tile along the output length: big tiles amortize per-step overhead;
    # drop to 512 for large C to stay inside the smaller VMEM budgets.
    if tile_lo is None:
        tile_lo = 1024 if C <= 256 else 512
    tLo = tile_lo if Lo >= tile_lo else Lo
    n_tiles = pl.cdiv(Lo, tLo)
    Lo_pad = n_tiles * tLo

    nb = batch_tile if batch_tile is not None else _pick_batch_tile(N, C, tLo)
    assert N % nb == 0, (N, nb)

    # Build the stacked even/odd phase input (one x-sized array; under jit the
    # pad/slice/concat producers can fuse into the pallas input DMA).
    #   even[m] = xp[2m]   = [0, x1, x3, ...]
    #   odd[m]  = xp[2m+1] = [x0, x2, x4, ...]
    x_even_body = x[:, :, 1::2]                       # x1, x3, ...  (len L//2)
    x_odd_body = x[:, :, 0::2]                        # x0, x2, ...  (len Lo)
    even_ext = jnp.pad(
        x_even_body,
        ((0, 0), (0, 0), (1, Lo_pad - x_even_body.shape[-1])))   # (N, C, Lo_pad+1)
    odd = jnp.pad(
        x_odd_body,
        ((0, 0), (0, 0), (0, Lo_pad - x_odd_body.shape[-1])))    # (N, C, Lo_pad)
    even = even_ext[:, :, :Lo_pad]
    eo = jnp.concatenate([even, odd], axis=1)                    # (N, 2C, Lo_pad)

    # Halo column per length tile: xp[2*(j+1)*tLo] == even_ext[(j+1)*tLo].
    halo = even_ext[:, :, tLo::tLo]                              # (N, C, n_tiles)
    halo = jnp.transpose(halo, (0, 2, 1))[:, :, :, None]         # (N, n_tiles, C, 1)

    w01 = jnp.concatenate([weight[:, :, 0], weight[:, :, 1]], axis=1)  # (C, 2C)
    w2 = weight[:, :, 2]                                               # (C, C)
    b2 = bias.reshape(C, 1)

    flops = 2 * N * C * C * K * Lo_pad
    bytes_accessed = 4 * (eo.size + halo.size + w01.size + w2.size + b2.size
                          + N * C * Lo_pad)

    out = pl.pallas_call(
        _downsample_kernel,
        out_shape=jax.ShapeDtypeStruct((N, C, Lo_pad), x.dtype),
        grid_spec=pltpu.PrefetchScalarGridSpec(
            num_scalar_prefetch=0,
            grid=(N // nb, n_tiles),
            in_specs=[
                pl.BlockSpec((nb, 2 * C, tLo), lambda n, j: (n, 0, j)),     # eo
                pl.BlockSpec((nb, None, C, 1), lambda n, j: (n, j, 0, 0)),  # halo
                pl.BlockSpec((C, 2 * C), lambda n, j: (0, 0)),              # W01
                pl.BlockSpec((C, C), lambda n, j: (0, 0)),                  # W2
                pl.BlockSpec((C, 1), lambda n, j: (0, 0)),                  # bias
            ],
            out_specs=pl.BlockSpec((nb, C, tLo), lambda n, j: (n, 0, j)),
        ),
        compiler_params=pltpu.CompilerParams(
            dimension_semantics=("parallel", "parallel"),
            allow_input_fusion=[True, True, False, False, False],
        ),
        cost_estimate=pl.CostEstimate(flops=flops, transcendentals=0,
                                      bytes_accessed=bytes_accessed),
    )(eo, halo, w01, w2, b2)

    if Lo_pad != Lo:
        out = out[:, :, :Lo]
    return out


def _reference(x, weight, bias):
    y = lax.conv_general_dilated(
        x, weight, window_strides=(2,), padding=((1, 1),),
        dimension_numbers=("NCH", "OIH", "NCH"),
        precision=lax.Precision.HIGHEST)
    y = y + bias[None, :, None]
    return jnp.where(y >= 0, y, NEG_SLOPE * y)


if __name__ == "__main__":
    key = jax.random.PRNGKey(0)
    K = 3

    # --- Case 1: small module-consistent shapes (single length tile, nb=2) ---
    N, C, L = 2, 4, 16
    kx, kw, kb = jax.random.split(key, 3)
    bound = 1.0 / jnp.sqrt(jnp.float32(C * K))
    x = jax.random.normal(kx, (N, C, L), dtype=jnp.float32)
    weight = jax.random.uniform(kw, (C, C, K), dtype=jnp.float32,
                                minval=-bound, maxval=bound)
    bias = jax.random.uniform(kb, (C,), dtype=jnp.float32,
                              minval=-bound, maxval=bound)

    fwd = jax.jit(downsampling_forward)
    out = jax.block_until_ready(fwd(x, weight, bias))
    ref = _reference(x, weight, bias)
    assert out.shape == (N, C, (L + 2 - K) // 2 + 1), out.shape
    assert jnp.allclose(out, ref, atol=1e-4, rtol=1e-4), \
        float(jnp.max(jnp.abs(out - ref)))

    # --- Case 2: multi-tile + non-divisible length (exercises roll/halo path) ---
    N2, C2, L2 = 2, 8, 500
    kx2, kw2, kb2 = jax.random.split(jax.random.PRNGKey(1), 3)
    bound2 = 1.0 / jnp.sqrt(jnp.float32(C2 * K))
    x2 = jax.random.normal(kx2, (N2, C2, L2), dtype=jnp.float32)
    w2 = jax.random.uniform(kw2, (C2, C2, K), dtype=jnp.float32,
                            minval=-bound2, maxval=bound2)
    b2 = jax.random.uniform(kb2, (C2,), dtype=jnp.float32,
                            minval=-bound2, maxval=bound2)
    out2 = jax.block_until_ready(
        downsampling_forward(x2, w2, b2, tile_lo=128))
    ref2 = _reference(x2, w2, b2)
    assert out2.shape == ref2.shape, (out2.shape, ref2.shape)
    assert jnp.allclose(out2, ref2, atol=1e-4, rtol=1e-4), \
        float(jnp.max(jnp.abs(out2 - ref2)))

    print("KERNEL_OK")
</pallas_src>

<mosaic_0001>
module attributes {stable_mosaic.version = 11 : i64} {
  func.func @_downsample_kernel(%arg0: i32, %arg1: i32, %arg2: memref<2x8x8xf32, #tpu.memory_space<vmem>>, %arg3: memref<2x1x4x1xf32, #tpu.memory_space<vmem>>, %arg4: memref<4x8xf32, #tpu.memory_space<vmem>>, %arg5: memref<4x4xf32, #tpu.memory_space<vmem>>, %arg6: memref<4x1xf32, #tpu.memory_space<vmem>>, %arg7: memref<2x4x8xf32, #tpu.memory_space<vmem>>) attributes {dimension_semantics = [#tpu.dimension_semantics<parallel>, #tpu.dimension_semantics<parallel>], iteration_bounds = array<i64: 1, 1>, scalar_prefetch = 0 : i64, scratch_operands = 0 : i64, tpu.core_type = #tpu.core_type<tc>, window_params = [{transform_indices = @transform_0, window_bounds = array<i64: 2, 8, 8>}, {transform_indices = @transform_1, window_bounds = array<i64: 2, 1, 4, 1>}, {pipeline_mode = #tpu.pipeline_mode<synchronous>, transform_indices = @transform_2, window_bounds = array<i64: 4, 8>}, {pipeline_mode = #tpu.pipeline_mode<synchronous>, transform_indices = @transform_3, window_bounds = array<i64: 4, 4>}, {pipeline_mode = #tpu.pipeline_mode<synchronous>, transform_indices = @transform_4, window_bounds = array<i64: 4, 1>}, {transform_indices = @transform_5, window_bounds = array<i64: 2, 4, 8>}]} {
    %c0 = arith.constant 0 : index
    %c0_0 = arith.constant 0 : index
    %0 = vector.load %arg4[%c0, %c0_0] : memref<4x8xf32, #tpu.memory_space<vmem>>, vector<4x8xf32>
    %c0_1 = arith.constant 0 : index
    %c0_2 = arith.constant 0 : index
    %1 = vector.load %arg5[%c0_1, %c0_2] : memref<4x4xf32, #tpu.memory_space<vmem>>, vector<4x4xf32>
    %c0_3 = arith.constant 0 : index
    %c0_4 = arith.constant 0 : index
    %2 = vector.load %arg6[%c0_3, %c0_4] : memref<4x1xf32, #tpu.memory_space<vmem>>, vector<4x1xf32>
    %c0_5 = arith.constant 0 : index
    %c0_6 = arith.constant 0 : index
    %c0_7 = arith.constant 0 : index
    %3 = vector.load %arg2[%c0_5, %c0_6, %c0_7] : memref<2x8x8xf32, #tpu.memory_space<vmem>>, vector<1x8x8xf32>
    %4 = vector.shape_cast %3 : vector<1x8x8xf32> to vector<8x8xf32>
    %cst = arith.constant dense<0.000000e+00> : vector<4x8xf32>
    %5 = tpu.matmul %0, %4, %cst {dimension_numbers = #tpu.dot_dimension_numbers<[1], [0], [0], [1], [0, 0, 1, 1], [], []>} : vector<4x8xf32>, vector<8x8xf32>, vector<4x8xf32> -> vector<4x8xf32>
    %6 = vector.broadcast %2 : vector<4x1xf32> to vector<4x8xf32>
    %7 = arith.addf %5, %6 : vector<4x8xf32>
    %8 = vector.extract_strided_slice %4 {offsets = [0, 0], sizes = [4, 8], strides = [1, 1]} : vector<8x8xf32> to vector<4x8xf32>
    %c7_i32 = arith.constant 7 : i32
    %9 = tpu.dynamic_rotate %8 by %c7_i32 dim 1 : vector<4x8xf32>, i32 -> vector<4x8xf32>
    %10 = tpu.iota {dimensions = array<i32: 1>} : vector<4x8xi32>
    %c7_i32_8 = arith.constant 7 : i32
    %11 = vector.broadcast %c7_i32_8 : i32 to vector<4x8xi32>
    %12 = arith.cmpi eq, %10, %11 : vector<4x8xi32>
    %c0_9 = arith.constant 0 : index
    %c0_10 = arith.constant 0 : index
    %c0_11 = arith.constant 0 : index
    %c0_12 = arith.constant 0 : index
    %13 = vector.load %arg3[%c0_9, %c0_10, %c0_11, %c0_12] : memref<2x1x4x1xf32, #tpu.memory_space<vmem>>, vector<1x1x4x1xf32>
    %14 = vector.shape_cast %13 : vector<1x1x4x1xf32> to vector<4x1xf32>
    %15 = vector.shape_cast %14 : vector<4x1xf32> to vector<4x1xf32>
    %16 = vector.broadcast %15 : vector<4x1xf32> to vector<4x8xf32>
    %17 = arith.select %12, %16, %9 : vector<4x8xi1>, vector<4x8xf32>
    %cst_13 = arith.constant dense<0.000000e+00> : vector<4x8xf32>
    %18 = tpu.matmul %1, %17, %cst_13 {dimension_numbers = #tpu.dot_dimension_numbers<[1], [0], [0], [1], [0, 0, 1, 1], [], []>} : vector<4x4xf32>, vector<4x8xf32>, vector<4x8xf32> -> vector<4x8xf32>
    %19 = arith.addf %7, %18 : vector<4x8xf32>
    %cst_14 = arith.constant 0.000000e+00 : f32
    %20 = vector.broadcast %cst_14 : f32 to vector<4x8xf32>
    %21 = arith.cmpf oge, %19, %20 : vector<4x8xf32>
    %cst_15 = arith.constant 0.00999999977 : f32
    %22 = vector.broadcast %cst_15 : f32 to vector<4x8xf32>
    %23 = arith.mulf %22, %19 : vector<4x8xf32>
    %24 = arith.select %21, %19, %23 : vector<4x8xi1>, vector<4x8xf32>
    %c0_16 = arith.constant 0 : index
    %c0_17 = arith.constant 0 : index
    %c0_18 = arith.constant 0 : index
    %25 = vector.load %arg7[%c0_16, %c0_17, %c0_18] : memref<2x4x8xf32, #tpu.memory_space<vmem>>, vector<1x4x8xf32>
    %26 = vector.shape_cast %25 : vector<1x4x8xf32> to vector<4x8xf32>
    %27 = vector.shape_cast %24 : vector<4x8xf32> to vector<1x4x8xf32>
    tpu.vector_store %arg7[%c0_16, %c0_17, %c0_18], %27 {strides = array<i32>} : memref<2x4x8xf32, #tpu.memory_space<vmem>>, vector<1x4x8xf32>,
    %c1 = arith.constant 1 : index
    %c0_19 = arith.constant 0 : index
    %c0_20 = arith.constant 0 : index
    %28 = vector.load %arg2[%c1, %c0_19, %c0_20] : memref<2x8x8xf32, #tpu.memory_space<vmem>>, vector<1x8x8xf32>
    %29 = vector.shape_cast %28 : vector<1x8x8xf32> to vector<8x8xf32>
    %cst_21 = arith.constant dense<0.000000e+00> : vector<4x8xf32>
    %30 = tpu.matmul %0, %29, %cst_21 {dimension_numbers = #tpu.dot_dimension_numbers<[1], [0], [0], [1], [0, 0, 1, 1], [], []>} : vector<4x8xf32>, vector<8x8xf32>, vector<4x8xf32> -> vector<4x8xf32>
    %31 = vector.broadcast %2 : vector<4x1xf32> to vector<4x8xf32>
    %32 = arith.addf %30, %31 : vector<4x8xf32>
    %33 = vector.extract_strided_slice %29 {offsets = [0, 0], sizes = [4, 8], strides = [1, 1]} : vector<8x8xf32> to vector<4x8xf32>
    %c7_i32_22 = arith.constant 7 : i32
    %34 = tpu.dynamic_rotate %33 by %c7_i32_22 dim 1 : vector<4x8xf32>, i32 -> vector<4x8xf32>
    %35 = tpu.iota {dimensions = array<i32: 1>} : vector<4x8xi32>
    %c7_i32_23 = arith.constant 7 : i32
    %36 = vector.broadcast %c7_i32_23 : i32 to vector<4x8xi32>
    %37 = arith.cmpi eq, %35, %36 : vector<4x8xi32>
    %c1_24 = arith.constant 1 : index
    %c0_25 = arith.constant 0 : index
    %c0_26 = arith.constant 0 : index
    %c0_27 = arith.constant 0 : index
    %38 = vector.load %arg3[%c1_24, %c0_25, %c0_26, %c0_27] : memref<2x1x4x1xf32, #tpu.memory_space<vmem>>, vector<1x1x4x1xf32>
    %39 = vector.shape_cast %38 : vector<1x1x4x1xf32> to vector<4x1xf32>
    %40 = vector.shape_cast %39 : vector<4x1xf32> to vector<4x1xf32>
    %41 = vector.broadcast %40 : vector<4x1xf32> to vector<4x8xf32>
    %42 = arith.select %37, %41, %34 : vector<4x8xi1>, vector<4x8xf32>
    %cst_28 = arith.constant dense<0.000000e+00> : vector<4x8xf32>
    %43 = tpu.matmul %1, %42, %cst_28 {dimension_numbers = #tpu.dot_dimension_numbers<[1], [0], [0], [1], [0, 0, 1, 1], [], []>} : vector<4x4xf32>, vector<4x8xf32>, vector<4x8xf32> -> vector<4x8xf32>
    %44 = arith.addf %32, %43 : vector<4x8xf32>
    %cst_29 = arith.constant 0.000000e+00 : f32
    %45 = vector.broadcast %cst_29 : f32 to vector<4x8xf32>
    %46 = arith.cmpf oge, %44, %45 : vector<4x8xf32>
    %cst_30 = arith.constant 0.00999999977 : f32
    %47 = vector.broadcast %cst_30 : f32 to vector<4x8xf32>
    %48 = arith.mulf %47, %44 : vector<4x8xf32>
    %49 = arith.select %46, %44, %48 : vector<4x8xi1>, vector<4x8xf32>
    %c1_31 = arith.constant 1 : index
    %c0_32 = arith.constant 0 : index
    %c0_33 = arith.constant 0 : index
    %50 = vector.load %arg7[%c1_31, %c0_32, %c0_33] : memref<2x4x8xf32, #tpu.memory_space<vmem>>, vector<1x4x8xf32>
    %51 = vector.shape_cast %50 : vector<1x4x8xf32> to vector<4x8xf32>
    %52 = vector.shape_cast %49 : vector<4x8xf32> to vector<1x4x8xf32>
    tpu.vector_store %arg7[%c1_31, %c0_32, %c0_33], %52 {strides = array<i32>} : memref<2x4x8xf32, #tpu.memory_space<vmem>>, vector<1x4x8xf32>,
    return
  }
  func.func @transform_0(%arg0: i32, %arg1: i32) -> (i32, i32, i32) {
    %c0_i32 = arith.constant 0 : i32
    %c0_i32_0 = arith.constant 0 : i32
    return %arg0, %c0_i32, %arg1 : i32, i32, i32
  }
  func.func @transform_1(%arg0: i32, %arg1: i32) -> (i32, i32, i32, i32) {
    %c0_i32 = arith.constant 0 : i32
    %c0_i32_0 = arith.constant 0 : i32
    %c0_i32_1 = arith.constant 0 : i32
    return %arg0, %arg1, %c0_i32, %c0_i32_0 : i32, i32, i32, i32
  }
  func.func @transform_2(%arg0: i32, %arg1: i32) -> (i32, i32) {
    %c0_i32 = arith.constant 0 : i32
    %c0_i32_0 = arith.constant 0 : i32
    %c0_i32_1 = arith.constant 0 : i32
    return %c0_i32, %c0_i32_0 : i32, i32
  }
  func.func @transform_3(%arg0: i32, %arg1: i32) -> (i32, i32) {
    %c0_i32 = arith.constant 0 : i32
    %c0_i32_0 = arith.constant 0 : i32
    %c0_i32_1 = arith.constant 0 : i32
    return %c0_i32, %c0_i32_0 : i32, i32
  }
  func.func @transform_4(%arg0: i32, %arg1: i32) -> (i32, i32) {
    %c0_i32 = arith.constant 0 : i32
    %c0_i32_0 = arith.constant 0 : i32
    %c0_i32_1 = arith.constant 0 : i32
    return %c0_i32, %c0_i32_0 : i32, i32
  }
  func.func @transform_5(%arg0: i32, %arg1: i32) -> (i32, i32, i32) {
    %c0_i32 = arith.constant 0 : i32
    %c0_i32_0 = arith.constant 0 : i32
    return %arg0, %c0_i32, %arg1 : i32, i32, i32
  }
}

</mosaic_0001>

<bundles_post_ra>
// kernel: downsampling_forward.2
= control target key start
LH: loop header
LB: loop body
LE: loop exit
PB: predicated region body
PF: predicated region fallthrough
CT: control target
= control target key end

     0   :  { %s720_s0 = inlined_call_operand.vmem [shape: f32[4,8], index: 0, kind: input, shape index: {}]   ;;  %s721_s1 = inlined_call_operand.vmem [shape: f32[4,4], index: 1, kind: input, shape index: {}]   ;;  %s722_s2 = inlined_call_operand.vmem [shape: f32[4,1], index: 2, kind: input, shape index: {}]   ;;  %s723_s3 = inlined_call_operand.vmem [shape: f32[2,4,8], index: 3, kind: input, shape index: {}]   ;;  %s724_s4 = inlined_call_operand.<no memory space> [shape: f32[], index: 4, kind: input, shape index: {}]   ;;  %s725_s5 = inlined_call_operand.vmem [shape: f32[2,4,8], index: 5, kind: input, shape index: {}]   ;;  %s726_s6 = inlined_call_operand.vmem [shape: f32[2,4,8], index: 6, kind: input, shape index: {}]   ;;  %s727_s7 = inlined_call_operand.hbm [shape: f32[2,4,8], index: 7, kind: output, shape index: {}]  }
   0x1   :  { %v12_v0 = vstv %s724_s4 }
   0x2   :  { %v60_v1 = vlaneseq  ;;  %v59_v2 = vld [vmem:[%s723_s3] sm:$0xf]  ;;  %v533_v7 = vld [vmem:[%s723_s3 + $0x4] sm:$0xf] }
   0x3   :  { %v73_v5 = vld [vmem:[%s725_s5] sm:$0xf] }
   0x4   :  { %v61_v3 = vshrl.u32 %v60_v1, 7  ;;  %v658_v4 = vand.u32 127, %v60_v1  ;;  %v132_v6 = vld [vmem:[%s726_s6] sm:$0xf] }
   0x5   :  { %14 = vsyncpa [#allocation18], 0  ;;  %v535_v9 = vld [vmem:[%s726_s6 + $0x4] sm:$0xf]  ;;  %vm70_vm4 = vcmask 1043456   ;;  %s603_s3 = smov 121  }
   0x6   :  { %v62_v8 = vadd.s32 8, %v61_v3  ;;  %vm77_vm0 = vcmp.lt.s32.totalorder %v61_v3, 4  ;;  %vm135_vm1 = vcmp.lt.s32.totalorder %v658_v4, 7  ;;  %vm68_vm2 = vcmp.lt.s32.totalorder %v658_v4, 8  ;;  %v534_v10 = vld [vmem:[%s725_s5 + $0x4] sm:$0xf] }
   0x7   :  { %v136_v11 = vsel %vm135_vm1, 0, %v132_v6  ;;  %v78_v12 = vsel %vm77_vm0, %v73_v5, %v12_v0  ;;  %v147_v15 = vsel %vm135_vm1, 0, %v535_v9  ;;  %v604_v16 = vmov 0.0   ;;  %v154_v28 = vld [vmem:[%s720_s0] sm:$0xf]  ;;  %s607_s14 = smov 8  }
   0x8   :  { %vm63_vm3 = vcmp.lt.s32.totalorder %v62_v8, 12  ;;  %137 = vrot.lane.b32.xlu1 %v136_v11, %s603_s3  ;;  %550 = vmatprep.subr.mxu0 %v604_v16  ;;  %v118_v19 = vsel %vm77_vm0, %v534_v10, %v12_v0  ;;  %vm605_vm5 = vmmov 0   ;;  %v83_v21 = vsel %vm68_vm2, %v78_v12, %v12_v0  ;;  %s608_s0 = smov 127   ;;  %v156_v43 = vld [vmem:[%s722_s2] sm:$0xf] }
   0x9   :  { %v64_v13 = vsel %vm63_vm3, %v59_v2, %v12_v0  ;;  %v103_v14 = vsel %vm63_vm3, %v533_v7, %v12_v0  ;;  %555 = vmatprep.subr.mxu1 %v604_v16  ;;  %552 = vmatprep.mubr.msk.f32.mxu0 %vm605_vm5, %v604_v16  ;;  %v606_v23 = vmov 0   ;;  %v123_v26 = vsel %vm68_vm2, %v118_v19, %v12_v0  ;;  %v155_v50 = vld [vmem:[%s721_s1] sm:$0xf]  ;;  %s609_s1 = smov [#allocation17]  }
   0xa   :  { %v69_v17 = vsel %vm68_vm2, %v64_v13, %v12_v0  ;;  %v108_v18 = vsel %vm68_vm2, %v103_v14, %v12_v0  ;;  %557 = vmatprep.mubr.msk.f32.mxu1 %vm605_vm5, %v604_v16  ;;  %579 = vset.pattern.permute.xlu0 %v606_v23  ;;  %vm163_vm6 = vcmask 64512   ;;  %vm237_vm7 = vcmask 1047616   ;;  %s516_s2 = sshll.u32 %s609_s1, 4  ;;  %s517_s2 = int_to_ptr.vmem [resolvable:$true] %s516_s2 }
   0xb   :  { %v71_v20 = vsel %vm70_vm4, %v69_v17, %v12_v0  ;;  %v110_v22 = vsel %vm70_vm4, %v108_v18, %v12_v0  ;;  %580 = vset.pattern.permute.xlu1 %v606_v23  ;;  %vm246_vm8 = vcmp.eq.s32.totalorder %v658_v4, 7  ;;  %vm258_vm9 = vcmask 31744   ;;  %s581_s19 = scalar_lea.vmem %s517_s2, 128  ;;  %p586_p1 = scmp.lt.s32.totalorder %s517_s2, %s517_s2 }
   0xc   :  { %v72_v24 = vrot.slane %v71_v20, 4  ;;  %v111_v25 = vrot.slane %v110_v22, 4  ;;  %148 = vrot.lane.b32.xlu1 %v147_v15, %s603_s3  ;;  %vm340_vm11 = vcmask 60416   ;;  %p582_p0 = scmp.ne.s32.totalorder %s517_s2, %s581_s19  ;;  %p587_p2 = scmp.lt.s32.totalorder %s581_s19, %s581_s19 }
   0xe   :  { %v86_v27 = vmax.f32 %v83_v21, %v72_v24  ;;  %v126_v29 = vmax.f32 %v123_v26, %v111_v25  ;;  %p588_p3 = por %p587_p2, %p586_p1 }
  0x10   :  { %238 = vrot.lane.b32.xlu0 %v86_v27, %s607_s14  ;;  %551 = vmatpush3.msra.mxu0 %v86_v27  ;;  %p589_p4 = pnand %p588_p3, %p582_p0 }
  0x11   :  { %553 = vmatmul.mubr.msk.f32.vlgmr.msra.gmra.mxu0 %vm163_vm6, %v154_v28  ;;  %560 = vmatprep.subr.mxu0 %v604_v16 }
  0x12   :  { %561 = vmatpush3.msra.mxu0 %v126_v29  ;;  %562 = vmatprep.mubr.msk.f32.mxu0 %vm605_vm5, %v604_v16 }
  0x14   :  { %414 = vrot.lane.b32.xlu0 %v126_v29, %s607_s14 }
  0x15   :  { %563 = vmatmul.mubr.msk.f32.vlgmr.msra.gmra.mxu0 %vm163_vm6, %v154_v28 }
  0x7a   :  { %v138_v30 = vpop.permute.xlu1 %137 }
  0x7b   :  { %141 = vst [vmem:[#allocation20] sm:$0xf] %v138_v30 }
  0x7e   :  { %v149_v31 = vpop.permute.xlu1 %148 }
  0x7f   :  { %153 = vst [vmem:[#allocation20 + $0x4] sm:$0xf] %v149_v31 }
  0x82   :  { %v239_v32 = vpop.permute.xlu0 %238  ;;  %v247_v34 = vld [vmem:[#allocation20] sm:$0xf] }
  0x83   :  { %v240_v33 = vsel %vm237_vm7, %v239_v32, %v86_v27 }
  0x84   :  { %241 = vrot.lane.b32.xlu0 %v240_v33, %s607_s14 }
  0x86   :  { %v415_v35 = vpop.permute.xlu0 %414  ;;  %v421_v37 = vld [vmem:[#allocation20 + $0x4] sm:$0xf] }
  0x87   :  { %v416_v36 = vsel %vm237_vm7, %v415_v35, %v126_v29 }
  0x88   :  { %417 = vrot.lane.b32.xlu1 %v416_v36, %s607_s14  ;;  %250 = vperm.xlu0 %579, %v247_v34  }
  0x8c   :  { %424 = vperm.xlu1 %580, %v421_v37  }
  0xd1   :  { %v233_v38 = vpop.f32.mrf.mxu0 }
  0xd3   :  { %v554_v39 = vpop.f32.mrf.mxu0 }
  0xd5   :  { %v410_v42 = vpop.f32.mrf.mxu0 }
  0xd7   :  { %v564_v44 = vpop.f32.mrf.mxu0 }
  0xf6   :  { %v242_v40 = vpop.permute.xlu0 %241 }
  0xf7   :  { %v243_v41 = vsel %vm237_vm7, %v242_v40, %v86_v27 }
  0xf8   :  { %254 = vrot.lane.b32.xlu1 %v243_v41, %s608_s0 }
  0xfa   :  { %v418_v45 = vpop.permute.xlu1 %417 }
  0xfb   :  { %v419_v46 = vsel %vm237_vm7, %v418_v45, %v126_v29 }
  0xfc   :  { %428 = vrot.lane.b32.xlu0 %v419_v46, %s608_s0  ;;  %160 = vperm.xlu1 %580, %v156_v43  }
 0x103   :  { %v251_v48 = vpop.permute.xlu0 %250 }
 0x107   :  { %v425_v47 = vpop.permute.xlu1 %424 }
 0x16a   :  { %v255_v49 = vpop.permute.xlu1 %254 }
 0x16b   :  { %v257_v51 = vsel %vm246_vm8, %v251_v48, %v255_v49 }
 0x16c   :  { %556 = vmatpush3.msk.msra.mxu1 %vm70_vm4, %v257_v51 }
 0x16d   :  { %558 = vmatmul.mubr.msk.f32.vlgmr.msra.gmra.mxu1 %vm258_vm9, %v155_v50  ;;  %565 = vmatprep.subr.mxu1 %v604_v16 }
 0x16e   :  { %v429_v52 = vpop.permute.xlu0 %428  ;;  %567 = vmatprep.mubr.msk.f32.mxu1 %vm605_vm5, %v604_v16 }
 0x16f   :  { %v431_v53 = vsel %vm246_vm8, %v425_v47, %v429_v52 }
 0x170   :  { %566 = vmatpush3.msk.msra.mxu1 %vm70_vm4, %v431_v53 }
 0x171   :  { %568 = vmatmul.mubr.msk.f32.vlgmr.msra.gmra.mxu1 %vm258_vm9, %v155_v50 }
 0x177   :  { %v161_v54 = vpop.permute.xlu1 %160 }
 0x178   :  { %v234_v55 = vadd.f32 %v233_v38, %v161_v54  ;;  %v411_v59 = vadd.f32 %v410_v42, %v161_v54 }
 0x22d   :  { %v332_v56 = vpop.f32.mrf.mxu1 }
 0x22e   :  { %v336_v57 = vadd.f32 %v332_v56, %v234_v55 }
 0x22f   :  { %v559_v58 = vpop.f32.mrf.mxu1 }
 0x230   :  { %vm337_vm10 = vcmp.ge.f32.partialorder %v336_v57, 0.0  ;;  %v338_v60 = vmul.f32 0.01, %v336_v57 }
 0x231   :  { %v501_v61 = vpop.f32.mrf.mxu1 }
 0x232   :  { %v339_v62 = vsel %vm337_vm10, %v336_v57, %v338_v60  ;;  %v505_v63 = vadd.f32 %v501_v61, %v411_v59 }
 0x233   :  { %341 = vst.msk [vmem:[#allocation17] sm:$0xf] %vm340_vm11, %v339_v62  ;;  %v569_v0 = vpop.f32.mrf.mxu1 }
 0x234   :  { %vm506_vm12 = vcmp.ge.f32.partialorder %v505_v63, 0.0  ;;  %v507_v1 = vmul.f32 0.01, %v505_v63 }
 0x236   :  { %v508_v2 = vsel %vm506_vm12, %v505_v63, %v507_v1 }
 0x237   :  { %510 = vst.msk [vmem:[#allocation17 + $0x4] sm:$0xf] %vm340_vm11, %v508_v2 }
 0x238   :  { %592 = shalt.err (!%p589_p4)
}
 0x239   :  { %s610_s20 = smov 64   ;;  %s611_s21 = smov 4  }
 0x23a   :  { %522 = dma.vmem_to_hbm [thread:$0]  %s517_s2, 128, %s727_s7, [#allocation18], %s610_s20, %s610_s20, %s611_s21  }
 0x23b   :  { %601 = dma.done.wait [#allocation18], 128  }
 0x23c   :  { %602 = vsyncadd [#allocation18], 4294967168 }
 0x23d   :  { %526 = vsyncpa [#allocation18], 1 }

</bundles_post_ra>
